<compile_context>
chip_gen: v7x
topology: tpu7x:2x2x1
jax: 0.10.0
libtpu: 0.0.40
codegen_flags: <defaults>
</compile_context>

<pallas_src>
import functools

import jax
import jax.numpy as jnp
from jax import lax
from jax.experimental import pallas as pl
from jax.experimental.pallas import tpu as pltpu


def lstm_fc_kernel(x_ref, wih_ref, whh_ref, b_ref, wfc_ref, bfc_ref, out_ref,
                   *, B, T):
    """Full LSTM recurrence + final FC in one invocation.

    x_ref      : (T*B, D) time-major rows (row t*B + b == x[b, t, :]).
    wih_ref    : (D, 4H)
    whh_ref    : (4H, 4H)  -- rows H:4H are zero padding (full-vreg h scheme)
    b_ref      : (1, 4H)   -- b_ih + b_hh folded
    wfc_ref    : (4H, 128) -- rows H:4H and cols C:128 are zero padding
    bfc_ref    : (1, 128)  -- cols C:128 zero
    out_ref    : (B, 128)  -- lane-dense; wrapper slices to (B, C)
    """
    H4 = wih_ref.shape[1]      # 4*H  (== 128 lanes -> one vreg per row tile)
    H = H4 // 4

    # Hoisted input projection for every (t, b) at once, bias folded in once:
    #   (T*B, D) @ (D, 4H) + (1, 4H)  ->  (T*B, 4H), time-major row order.
    x_proj = (jnp.dot(x_ref[...], wih_ref[...],
                      preferred_element_type=jnp.float32)
              + b_ref[...])
    # Step t is one contiguous (B, 4H) = (8, 128) vreg slab.
    x_proj = x_proj.reshape(T, B, H4)

    w_hh = whh_ref[...]        # read once, reuse every step (rows H:4H zero)

    # h / c live as full (B, 4H) = (8, 128) vregs; only lanes 0:H are "real".
    h = jnp.zeros((B, H4), jnp.float32)
    c = jnp.zeros((B, H4), jnp.float32)

    # T is a small static trip count: fully unroll so every slice is static
    # and the whole recurrence is visible to the scheduler.
    for t in range(T):
        # Junk lanes of h hit zero rows of the padded W_hh -> gates exact.
        gates = x_proj[t] + jnp.dot(h, w_hh,
                                    preferred_element_type=jnp.float32)

        # Full-vreg activations: 2 EUP pushes per step instead of 4 quarter-
        # utilized ones, and zero per-step lane relayout from 32-lane slices.
        # sigmoid(x) == 0.5 * tanh(0.5 * x) + 0.5  (single EUP push).
        sig = 0.5 * jnp.tanh(0.5 * gates) + 0.5    # i / f / o wherever they sit
        tah = jnp.tanh(gates)                      # g wherever it sits

        # Align f / g / o onto lanes 0:H with static XLU lane rotations
        # (np.roll semantics: output[j] = input[(j - shift) mod 4H]).
        i_g = sig                                   # i already in lanes 0:H
        f_g = pltpu.roll(sig, shift=3 * H, axis=1)  # lanes H:2H   -> 0:H
        g_g = pltpu.roll(tah, shift=2 * H, axis=1)  # lanes 2H:3H  -> 0:H
        o_g = pltpu.roll(sig, shift=1 * H, axis=1)  # lanes 3H:4H  -> 0:H

        # Junk lanes stay bounded (|sig|<=1, |tah|<=1), so they remain finite
        # and are annihilated by the zero rows of W_hh / W_fc.
        c = f_g * c + i_g * g_g
        h = o_g * jnp.tanh(c)

    # Final FC on the last hidden state with lane-padded weights:
    #   (B, 4H) @ (4H, 128) + (1, 128)  ->  unmasked lane-dense (B, 128) store.
    out_ref[...] = (jnp.dot(h, wfc_ref[...],
                            preferred_element_type=jnp.float32)
                    + bfc_ref[...]).astype(out_ref.dtype)


def emotion_classifier_lstm(x, w_ih, w_hh, bias, w_fc, b_fc):
    """x: (B, T, D) float32 (PyTorch batch_first convention)."""
    B, T, D = x.shape
    H = w_hh.shape[0]
    C = w_fc.shape[1]
    H4 = 4 * H
    LANES = 128  # lane-dense FC output width

    # One-time time-major reorder of the tiny (8 KiB) input so every per-step
    # read inside the kernel is a contiguous (B, 4H) vreg slab.
    x_tm = jnp.swapaxes(x, 0, 1).reshape(T * B, D)

    # Zero-pad W_hh rows to (4H, 4H) so h/c stay full 128-lane vregs, and pad
    # the FC weights / bias to a lane-dense (·, 128) output.
    w_hh_pad = jnp.zeros((H4, H4), w_hh.dtype).at[:H, :].set(w_hh)
    w_fc_pad = jnp.zeros((H4, LANES), w_fc.dtype).at[:H, :C].set(w_fc)
    b_fc_pad = jnp.zeros((1, LANES), b_fc.dtype).at[:, :C].set(b_fc)

    kernel = functools.partial(lstm_fc_kernel, B=B, T=T)
    vmem = pl.BlockSpec(memory_space=pltpu.MemorySpace.VMEM)

    out_pad = pl.pallas_call(
        kernel,
        out_shape=jax.ShapeDtypeStruct((B, LANES), jnp.float32),
        in_specs=[vmem] * 6,      # no grid: everything fully VMEM-resident
        out_specs=vmem,
    )(x_tm, w_ih, w_hh_pad, bias, w_fc_pad, b_fc_pad)

    return out_pad[:, :C]


def reference_lstm_fc(x, w_ih, w_hh, bias, w_fc, b_fc):
    """Pure-JAX reference (same math as torch.nn.LSTM + Linear)."""
    B, T, D = x.shape
    H = w_hh.shape[0]

    def step(carry, x_t):
        h, c = carry
        gates = x_t @ w_ih + h @ w_hh + bias[0]
        i = jax.nn.sigmoid(gates[:, 0 * H:1 * H])
        f = jax.nn.sigmoid(gates[:, 1 * H:2 * H])
        g = jnp.tanh(gates[:, 2 * H:3 * H])
        o = jax.nn.sigmoid(gates[:, 3 * H:4 * H])
        c = f * c + i * g
        h = o * jnp.tanh(c)
        return (h, c), None

    h0 = jnp.zeros((B, H), jnp.float32)
    c0 = jnp.zeros((B, H), jnp.float32)
    (h_last, _), _ = lax.scan(step, (h0, c0), jnp.transpose(x, (1, 0, 2)))
    return h_last @ w_fc + b_fc[0]


if __name__ == "__main__":
    # Small shapes consistent with the module's forward:
    #   x: (batch, seq, input_size); hidden kept small so 4H = 128 exactly
    #   fills the lane width; num_classes = 6 as in the original module.
    B, T, D, H, C = 8, 8, 32, 32, 6

    key = jax.random.PRNGKey(0)
    kx, k1, k2, k3, k4, k5, k6 = jax.random.split(key, 7)

    x = jax.random.normal(kx, (B, T, D), jnp.float32)

    # Deterministic parameter init (shapes match nn.LSTM / nn.Linear, stored
    # transposed; gate order i,f,g,o along the 4H axis).
    scale = 0.1
    w_ih = scale * jax.random.normal(k1, (D, 4 * H), jnp.float32)
    w_hh = scale * jax.random.normal(k2, (H, 4 * H), jnp.float32)
    b_ih = scale * jax.random.normal(k3, (4 * H,), jnp.float32)
    b_hh = scale * jax.random.normal(k4, (4 * H,), jnp.float32)
    bias = (b_ih + b_hh).reshape(1, 4 * H)
    w_fc = scale * jax.random.normal(k5, (H, C), jnp.float32)
    b_fc = scale * jax.random.normal(k6, (C,), jnp.float32).reshape(1, C)

    out = emotion_classifier_lstm(x, w_ih, w_hh, bias, w_fc, b_fc)
    out = jax.block_until_ready(out)

    ref = reference_lstm_fc(x, w_ih, w_hh, bias, w_fc, b_fc)
    assert out.shape == (B, C)
    assert jnp.allclose(out, ref, atol=1e-4, rtol=1e-4), "mismatch vs reference"

    print("KERNEL_OK")
</pallas_src>

<mosaic_0001>
module attributes {stable_mosaic.version = 11 : i64} {
  func.func @lstm_fc_kernel(%arg0: memref<64x32xf32, #tpu.memory_space<vmem>>, %arg1: memref<32x128xf32, #tpu.memory_space<vmem>>, %arg2: memref<128x128xf32, #tpu.memory_space<vmem>>, %arg3: memref<1x128xf32, #tpu.memory_space<vmem>>, %arg4: memref<128x128xf32, #tpu.memory_space<vmem>>, %arg5: memref<1x128xf32, #tpu.memory_space<vmem>>, %arg6: memref<8x128xf32, #tpu.memory_space<vmem>>) attributes {dimension_semantics = [], scalar_prefetch = 0 : i64, scratch_operands = 0 : i64, tpu.core_type = #tpu.core_type<tc>} {
    %c0 = arith.constant 0 : index
    %c0_0 = arith.constant 0 : index
    %0 = vector.load %arg0[%c0, %c0_0] : memref<64x32xf32, #tpu.memory_space<vmem>>, vector<64x32xf32>
    %c0_1 = arith.constant 0 : index
    %c0_2 = arith.constant 0 : index
    %1 = vector.load %arg1[%c0_1, %c0_2] : memref<32x128xf32, #tpu.memory_space<vmem>>, vector<32x128xf32>
    %cst = arith.constant dense<0.000000e+00> : vector<64x128xf32>
    %2 = tpu.matmul %0, %1, %cst {dimension_numbers = #tpu.dot_dimension_numbers<[1], [0], [0], [1], [0, 0, 1, 1], [], []>} : vector<64x32xf32>, vector<32x128xf32>, vector<64x128xf32> -> vector<64x128xf32>
    %c0_3 = arith.constant 0 : index
    %c0_4 = arith.constant 0 : index
    %3 = vector.load %arg3[%c0_3, %c0_4] : memref<1x128xf32, #tpu.memory_space<vmem>>, vector<1x128xf32>
    %4 = vector.broadcast %3 : vector<1x128xf32> to vector<64x128xf32>
    %5 = arith.addf %2, %4 : vector<64x128xf32>
    %6 = vector.shape_cast %5 : vector<64x128xf32> to vector<8x8x128xf32>
    %c0_5 = arith.constant 0 : index
    %c0_6 = arith.constant 0 : index
    %7 = vector.load %arg2[%c0_5, %c0_6] : memref<128x128xf32, #tpu.memory_space<vmem>>, vector<128x128xf32>
    %cst_7 = arith.constant 0.000000e+00 : f32
    %8 = vector.broadcast %cst_7 : f32 to vector<8x128xf32>
    %cst_8 = arith.constant 0.000000e+00 : f32
    %9 = vector.broadcast %cst_8 : f32 to vector<8x128xf32>
    %10 = vector.extract_strided_slice %6 {offsets = [0, 0, 0], sizes = [1, 8, 128], strides = [1, 1, 1]} : vector<8x8x128xf32> to vector<1x8x128xf32>
    %11 = vector.shape_cast %10 : vector<1x8x128xf32> to vector<8x128xf32>
    %cst_9 = arith.constant dense<0.000000e+00> : vector<8x128xf32>
    %12 = tpu.matmul %8, %7, %cst_9 {dimension_numbers = #tpu.dot_dimension_numbers<[1], [0], [0], [1], [0, 0, 1, 1], [], []>} : vector<8x128xf32>, vector<128x128xf32>, vector<8x128xf32> -> vector<8x128xf32>
    %13 = arith.addf %11, %12 : vector<8x128xf32>
    %cst_10 = arith.constant 5.000000e-01 : f32
    %14 = vector.broadcast %cst_10 : f32 to vector<8x128xf32>
    %15 = arith.mulf %14, %13 : vector<8x128xf32>
    %16 = math.tanh %15 : vector<8x128xf32>
    %cst_11 = arith.constant 5.000000e-01 : f32
    %17 = vector.broadcast %cst_11 : f32 to vector<8x128xf32>
    %18 = arith.mulf %17, %16 : vector<8x128xf32>
    %cst_12 = arith.constant 5.000000e-01 : f32
    %19 = vector.broadcast %cst_12 : f32 to vector<8x128xf32>
    %20 = arith.addf %18, %19 : vector<8x128xf32>
    %21 = math.tanh %13 : vector<8x128xf32>
    %c96_i32 = arith.constant 96 : i32
    %22 = tpu.dynamic_rotate %20 by %c96_i32 dim 1 : vector<8x128xf32>, i32 -> vector<8x128xf32>
    %c64_i32 = arith.constant 64 : i32
    %23 = tpu.dynamic_rotate %21 by %c64_i32 dim 1 : vector<8x128xf32>, i32 -> vector<8x128xf32>
    %c32_i32 = arith.constant 32 : i32
    %24 = tpu.dynamic_rotate %20 by %c32_i32 dim 1 : vector<8x128xf32>, i32 -> vector<8x128xf32>
    %25 = arith.mulf %22, %9 : vector<8x128xf32>
    %26 = arith.mulf %20, %23 : vector<8x128xf32>
    %27 = arith.addf %25, %26 : vector<8x128xf32>
    %28 = math.tanh %27 : vector<8x128xf32>
    %29 = arith.mulf %24, %28 : vector<8x128xf32>
    %30 = vector.extract_strided_slice %6 {offsets = [1, 0, 0], sizes = [1, 8, 128], strides = [1, 1, 1]} : vector<8x8x128xf32> to vector<1x8x128xf32>
    %31 = vector.shape_cast %30 : vector<1x8x128xf32> to vector<8x128xf32>
    %cst_13 = arith.constant dense<0.000000e+00> : vector<8x128xf32>
    %32 = tpu.matmul %29, %7, %cst_13 {dimension_numbers = #tpu.dot_dimension_numbers<[1], [0], [0], [1], [0, 0, 1, 1], [], []>} : vector<8x128xf32>, vector<128x128xf32>, vector<8x128xf32> -> vector<8x128xf32>
    %33 = arith.addf %31, %32 : vector<8x128xf32>
    %cst_14 = arith.constant 5.000000e-01 : f32
    %34 = vector.broadcast %cst_14 : f32 to vector<8x128xf32>
    %35 = arith.mulf %34, %33 : vector<8x128xf32>
    %36 = math.tanh %35 : vector<8x128xf32>
    %cst_15 = arith.constant 5.000000e-01 : f32
    %37 = vector.broadcast %cst_15 : f32 to vector<8x128xf32>
    %38 = arith.mulf %37, %36 : vector<8x128xf32>
    %cst_16 = arith.constant 5.000000e-01 : f32
    %39 = vector.broadcast %cst_16 : f32 to vector<8x128xf32>
    %40 = arith.addf %38, %39 : vector<8x128xf32>
    %41 = math.tanh %33 : vector<8x128xf32>
    %c96_i32_17 = arith.constant 96 : i32
    %42 = tpu.dynamic_rotate %40 by %c96_i32_17 dim 1 : vector<8x128xf32>, i32 -> vector<8x128xf32>
    %c64_i32_18 = arith.constant 64 : i32
    %43 = tpu.dynamic_rotate %41 by %c64_i32_18 dim 1 : vector<8x128xf32>, i32 -> vector<8x128xf32>
    %c32_i32_19 = arith.constant 32 : i32
    %44 = tpu.dynamic_rotate %40 by %c32_i32_19 dim 1 : vector<8x128xf32>, i32 -> vector<8x128xf32>
    %45 = arith.mulf %42, %27 : vector<8x128xf32>
    %46 = arith.mulf %40, %43 : vector<8x128xf32>
    %47 = arith.addf %45, %46 : vector<8x128xf32>
    %48 = math.tanh %47 : vector<8x128xf32>
    %49 = arith.mulf %44, %48 : vector<8x128xf32>
    %50 = vector.extract_strided_slice %6 {offsets = [2, 0, 0], sizes = [1, 8, 128], strides = [1, 1, 1]} : vector<8x8x128xf32> to vector<1x8x128xf32>
    %51 = vector.shape_cast %50 : vector<1x8x128xf32> to vector<8x128xf32>
    %cst_20 = arith.constant dense<0.000000e+00> : vector<8x128xf32>
    %52 = tpu.matmul %49, %7, %cst_20 {dimension_numbers = #tpu.dot_dimension_numbers<[1], [0], [0], [1], [0, 0, 1, 1], [], []>} : vector<8x128xf32>, vector<128x128xf32>, vector<8x128xf32> -> vector<8x128xf32>
    %53 = arith.addf %51, %52 : vector<8x128xf32>
    %cst_21 = arith.constant 5.000000e-01 : f32
    %54 = vector.broadcast %cst_21 : f32 to vector<8x128xf32>
    %55 = arith.mulf %54, %53 : vector<8x128xf32>
    %56 = math.tanh %55 : vector<8x128xf32>
    %cst_22 = arith.constant 5.000000e-01 : f32
    %57 = vector.broadcast %cst_22 : f32 to vector<8x128xf32>
    %58 = arith.mulf %57, %56 : vector<8x128xf32>
    %cst_23 = arith.constant 5.000000e-01 : f32
    %59 = vector.broadcast %cst_23 : f32 to vector<8x128xf32>
    %60 = arith.addf %58, %59 : vector<8x128xf32>
    %61 = math.tanh %53 : vector<8x128xf32>
    %c96_i32_24 = arith.constant 96 : i32
    %62 = tpu.dynamic_rotate %60 by %c96_i32_24 dim 1 : vector<8x128xf32>, i32 -> vector<8x128xf32>
    %c64_i32_25 = arith.constant 64 : i32
    %63 = tpu.dynamic_rotate %61 by %c64_i32_25 dim 1 : vector<8x128xf32>, i32 -> vector<8x128xf32>
    %c32_i32_26 = arith.constant 32 : i32
    %64 = tpu.dynamic_rotate %60 by %c32_i32_26 dim 1 : vector<8x128xf32>, i32 -> vector<8x128xf32>
    %65 = arith.mulf %62, %47 : vector<8x128xf32>
    %66 = arith.mulf %60, %63 : vector<8x128xf32>
    %67 = arith.addf %65, %66 : vector<8x128xf32>
    %68 = math.tanh %67 : vector<8x128xf32>
    %69 = arith.mulf %64, %68 : vector<8x128xf32>
    %70 = vector.extract_strided_slice %6 {offsets = [3, 0, 0], sizes = [1, 8, 128], strides = [1, 1, 1]} : vector<8x8x128xf32> to vector<1x8x128xf32>
    %71 = vector.shape_cast %70 : vector<1x8x128xf32> to vector<8x128xf32>
    %cst_27 = arith.constant dense<0.000000e+00> : vector<8x128xf32>
    %72 = tpu.matmul %69, %7, %cst_27 {dimension_numbers = #tpu.dot_dimension_numbers<[1], [0], [0], [1], [0, 0, 1, 1], [], []>} : vector<8x128xf32>, vector<128x128xf32>, vector<8x128xf32> -> vector<8x128xf32>
    %73 = arith.addf %71, %72 : vector<8x128xf32>
    %cst_28 = arith.constant 5.000000e-01 : f32
    %74 = vector.broadcast %cst_28 : f32 to vector<8x128xf32>
    %75 = arith.mulf %74, %73 : vector<8x128xf32>
    %76 = math.tanh %75 : vector<8x128xf32>
    %cst_29 = arith.constant 5.000000e-01 : f32
    %77 = vector.broadcast %cst_29 : f32 to vector<8x128xf32>
    %78 = arith.mulf %77, %76 : vector<8x128xf32>
    %cst_30 = arith.constant 5.000000e-01 : f32
    %79 = vector.broadcast %cst_30 : f32 to vector<8x128xf32>
    %80 = arith.addf %78, %79 : vector<8x128xf32>
    %81 = math.tanh %73 : vector<8x128xf32>
    %c96_i32_31 = arith.constant 96 : i32
    %82 = tpu.dynamic_rotate %80 by %c96_i32_31 dim 1 : vector<8x128xf32>, i32 -> vector<8x128xf32>
    %c64_i32_32 = arith.constant 64 : i32
    %83 = tpu.dynamic_rotate %81 by %c64_i32_32 dim 1 : vector<8x128xf32>, i32 -> vector<8x128xf32>
    %c32_i32_33 = arith.constant 32 : i32
    %84 = tpu.dynamic_rotate %80 by %c32_i32_33 dim 1 : vector<8x128xf32>, i32 -> vector<8x128xf32>
    %85 = arith.mulf %82, %67 : vector<8x128xf32>
    %86 = arith.mulf %80, %83 : vector<8x128xf32>
    %87 = arith.addf %85, %86 : vector<8x128xf32>
    %88 = math.tanh %87 : vector<8x128xf32>
    %89 = arith.mulf %84, %88 : vector<8x128xf32>
    %90 = vector.extract_strided_slice %6 {offsets = [4, 0, 0], sizes = [1, 8, 128], strides = [1, 1, 1]} : vector<8x8x128xf32> to vector<1x8x128xf32>
    %91 = vector.shape_cast %90 : vector<1x8x128xf32> to vector<8x128xf32>
    %cst_34 = arith.constant dense<0.000000e+00> : vector<8x128xf32>
    %92 = tpu.matmul %89, %7, %cst_34 {dimension_numbers = #tpu.dot_dimension_numbers<[1], [0], [0], [1], [0, 0, 1, 1], [], []>} : vector<8x128xf32>, vector<128x128xf32>, vector<8x128xf32> -> vector<8x128xf32>
    %93 = arith.addf %91, %92 : vector<8x128xf32>
    %cst_35 = arith.constant 5.000000e-01 : f32
    %94 = vector.broadcast %cst_35 : f32 to vector<8x128xf32>
    %95 = arith.mulf %94, %93 : vector<8x128xf32>
    %96 = math.tanh %95 : vector<8x128xf32>
    %cst_36 = arith.constant 5.000000e-01 : f32
    %97 = vector.broadcast %cst_36 : f32 to vector<8x128xf32>
    %98 = arith.mulf %97, %96 : vector<8x128xf32>
    %cst_37 = arith.constant 5.000000e-01 : f32
    %99 = vector.broadcast %cst_37 : f32 to vector<8x128xf32>
    %100 = arith.addf %98, %99 : vector<8x128xf32>
    %101 = math.tanh %93 : vector<8x128xf32>
    %c96_i32_38 = arith.constant 96 : i32
    %102 = tpu.dynamic_rotate %100 by %c96_i32_38 dim 1 : vector<8x128xf32>, i32 -> vector<8x128xf32>
    %c64_i32_39 = arith.constant 64 : i32
    %103 = tpu.dynamic_rotate %101 by %c64_i32_39 dim 1 : vector<8x128xf32>, i32 -> vector<8x128xf32>
    %c32_i32_40 = arith.constant 32 : i32
    %104 = tpu.dynamic_rotate %100 by %c32_i32_40 dim 1 : vector<8x128xf32>, i32 -> vector<8x128xf32>
    %105 = arith.mulf %102, %87 : vector<8x128xf32>
    %106 = arith.mulf %100, %103 : vector<8x128xf32>
    %107 = arith.addf %105, %106 : vector<8x128xf32>
    %108 = math.tanh %107 : vector<8x128xf32>
    %109 = arith.mulf %104, %108 : vector<8x128xf32>
    %110 = vector.extract_strided_slice %6 {offsets = [5, 0, 0], sizes = [1, 8, 128], strides = [1, 1, 1]} : vector<8x8x128xf32> to vector<1x8x128xf32>
    %111 = vector.shape_cast %110 : vector<1x8x128xf32> to vector<8x128xf32>
    %cst_41 = arith.constant dense<0.000000e+00> : vector<8x128xf32>
    %112 = tpu.matmul %109, %7, %cst_41 {dimension_numbers = #tpu.dot_dimension_numbers<[1], [0], [0], [1], [0, 0, 1, 1], [], []>} : vector<8x128xf32>, vector<128x128xf32>, vector<8x128xf32> -> vector<8x128xf32>
    %113 = arith.addf %111, %112 : vector<8x128xf32>
    %cst_42 = arith.constant 5.000000e-01 : f32
    %114 = vector.broadcast %cst_42 : f32 to vector<8x128xf32>
    %115 = arith.mulf %114, %113 : vector<8x128xf32>
    %116 = math.tanh %115 : vector<8x128xf32>
    %cst_43 = arith.constant 5.000000e-01 : f32
    %117 = vector.broadcast %cst_43 : f32 to vector<8x128xf32>
    %118 = arith.mulf %117, %116 : vector<8x128xf32>
    %cst_44 = arith.constant 5.000000e-01 : f32
    %119 = vector.broadcast %cst_44 : f32 to vector<8x128xf32>
    %120 = arith.addf %118, %119 : vector<8x128xf32>
    %121 = math.tanh %113 : vector<8x128xf32>
    %c96_i32_45 = arith.constant 96 : i32
    %122 = tpu.dynamic_rotate %120 by %c96_i32_45 dim 1 : vector<8x128xf32>, i32 -> vector<8x128xf32>
    %c64_i32_46 = arith.constant 64 : i32
    %123 = tpu.dynamic_rotate %121 by %c64_i32_46 dim 1 : vector<8x128xf32>, i32 -> vector<8x128xf32>
    %c32_i32_47 = arith.constant 32 : i32
    %124 = tpu.dynamic_rotate %120 by %c32_i32_47 dim 1 : vector<8x128xf32>, i32 -> vector<8x128xf32>
    %125 = arith.mulf %122, %107 : vector<8x128xf32>
    %126 = arith.mulf %120, %123 : vector<8x128xf32>
    %127 = arith.addf %125, %126 : vector<8x128xf32>
    %128 = math.tanh %127 : vector<8x128xf32>
    %129 = arith.mulf %124, %128 : vector<8x128xf32>
    %130 = vector.extract_strided_slice %6 {offsets = [6, 0, 0], sizes = [1, 8, 128], strides = [1, 1, 1]} : vector<8x8x128xf32> to vector<1x8x128xf32>
    %131 = vector.shape_cast %130 : vector<1x8x128xf32> to vector<8x128xf32>
    %cst_48 = arith.constant dense<0.000000e+00> : vector<8x128xf32>
    %132 = tpu.matmul %129, %7, %cst_48 {dimension_numbers = #tpu.dot_dimension_numbers<[1], [0], [0], [1], [0, 0, 1, 1], [], []>} : vector<8x128xf32>, vector<128x128xf32>, vector<8x128xf32> -> vector<8x128xf32>
    %133 = arith.addf %131, %132 : vector<8x128xf32>
    %cst_49 = arith.constant 5.000000e-01 : f32
    %134 = vector.broadcast %cst_49 : f32 to vector<8x128xf32>
    %135 = arith.mulf %134, %133 : vector<8x128xf32>
    %136 = math.tanh %135 : vector<8x128xf32>
    %cst_50 = arith.constant 5.000000e-01 : f32
    %137 = vector.broadcast %cst_50 : f32 to vector<8x128xf32>
    %138 = arith.mulf %137, %136 : vector<8x128xf32>
    %cst_51 = arith.constant 5.000000e-01 : f32
    %139 = vector.broadcast %cst_51 : f32 to vector<8x128xf32>
    %140 = arith.addf %138, %139 : vector<8x128xf32>
    %141 = math.tanh %133 : vector<8x128xf32>
    %c96_i32_52 = arith.constant 96 : i32
    %142 = tpu.dynamic_rotate %140 by %c96_i32_52 dim 1 : vector<8x128xf32>, i32 -> vector<8x128xf32>
    %c64_i32_53 = arith.constant 64 : i32
    %143 = tpu.dynamic_rotate %141 by %c64_i32_53 dim 1 : vector<8x128xf32>, i32 -> vector<8x128xf32>
    %c32_i32_54 = arith.constant 32 : i32
    %144 = tpu.dynamic_rotate %140 by %c32_i32_54 dim 1 : vector<8x128xf32>, i32 -> vector<8x128xf32>
    %145 = arith.mulf %142, %127 : vector<8x128xf32>
    %146 = arith.mulf %140, %143 : vector<8x128xf32>
    %147 = arith.addf %145, %146 : vector<8x128xf32>
    %148 = math.tanh %147 : vector<8x128xf32>
    %149 = arith.mulf %144, %148 : vector<8x128xf32>
    %150 = vector.extract_strided_slice %6 {offsets = [7, 0, 0], sizes = [1, 8, 128], strides = [1, 1, 1]} : vector<8x8x128xf32> to vector<1x8x128xf32>
    %151 = vector.shape_cast %150 : vector<1x8x128xf32> to vector<8x128xf32>
    %cst_55 = arith.constant dense<0.000000e+00> : vector<8x128xf32>
    %152 = tpu.matmul %149, %7, %cst_55 {dimension_numbers = #tpu.dot_dimension_numbers<[1], [0], [0], [1], [0, 0, 1, 1], [], []>} : vector<8x128xf32>, vector<128x128xf32>, vector<8x128xf32> -> vector<8x128xf32>
    %153 = arith.addf %151, %152 : vector<8x128xf32>
    %cst_56 = arith.constant 5.000000e-01 : f32
    %154 = vector.broadcast %cst_56 : f32 to vector<8x128xf32>
    %155 = arith.mulf %154, %153 : vector<8x128xf32>
    %156 = math.tanh %155 : vector<8x128xf32>
    %cst_57 = arith.constant 5.000000e-01 : f32
    %157 = vector.broadcast %cst_57 : f32 to vector<8x128xf32>
    %158 = arith.mulf %157, %156 : vector<8x128xf32>
    %cst_58 = arith.constant 5.000000e-01 : f32
    %159 = vector.broadcast %cst_58 : f32 to vector<8x128xf32>
    %160 = arith.addf %158, %159 : vector<8x128xf32>
    %161 = math.tanh %153 : vector<8x128xf32>
    %c96_i32_59 = arith.constant 96 : i32
    %162 = tpu.dynamic_rotate %160 by %c96_i32_59 dim 1 : vector<8x128xf32>, i32 -> vector<8x128xf32>
    %c64_i32_60 = arith.constant 64 : i32
    %163 = tpu.dynamic_rotate %161 by %c64_i32_60 dim 1 : vector<8x128xf32>, i32 -> vector<8x128xf32>
    %c32_i32_61 = arith.constant 32 : i32
    %164 = tpu.dynamic_rotate %160 by %c32_i32_61 dim 1 : vector<8x128xf32>, i32 -> vector<8x128xf32>
    %165 = arith.mulf %162, %147 : vector<8x128xf32>
    %166 = arith.mulf %160, %163 : vector<8x128xf32>
    %167 = arith.addf %165, %166 : vector<8x128xf32>
    %168 = math.tanh %167 : vector<8x128xf32>
    %169 = arith.mulf %164, %168 : vector<8x128xf32>
    %c0_62 = arith.constant 0 : index
    %c0_63 = arith.constant 0 : index
    %170 = vector.load %arg4[%c0_62, %c0_63] : memref<128x128xf32, #tpu.memory_space<vmem>>, vector<128x128xf32>
    %cst_64 = arith.constant dense<0.000000e+00> : vector<8x128xf32>
    %171 = tpu.matmul %169, %170, %cst_64 {dimension_numbers = #tpu.dot_dimension_numbers<[1], [0], [0], [1], [0, 0, 1, 1], [], []>} : vector<8x128xf32>, vector<128x128xf32>, vector<8x128xf32> -> vector<8x128xf32>
    %c0_65 = arith.constant 0 : index
    %c0_66 = arith.constant 0 : index
    %172 = vector.load %arg5[%c0_65, %c0_66] : memref<1x128xf32, #tpu.memory_space<vmem>>, vector<1x128xf32>
    %173 = vector.broadcast %172 : vector<1x128xf32> to vector<8x128xf32>
    %174 = arith.addf %171, %173 : vector<8x128xf32>
    %c0_67 = arith.constant 0 : index
    %c0_68 = arith.constant 0 : index
    %175 = vector.load %arg6[%c0_67, %c0_68] : memref<8x128xf32, #tpu.memory_space<vmem>>, vector<8x128xf32>
    tpu.vector_store %arg6[%c0_67, %c0_68], %174 {strides = array<i32>} : memref<8x128xf32, #tpu.memory_space<vmem>>, vector<8x128xf32>,
    return
  }
}

</mosaic_0001>

<bundles_post_ra>
// kernel: tpu_custom_call.1
= control target key start
LH: loop header
LB: loop body
LE: loop exit
PB: predicated region body
PF: predicated region fallthrough
CT: control target
= control target key end

     0   :  { %11 = vsyncpa [#allocation3], 0  ;;  %s2243_s0 = inlined_call_operand.vmem [shape: f32[64,32], index: 0, kind: input, shape index: {}]   ;;  %s2244_s1 = inlined_call_operand.vmem [shape: f32[32,128], index: 1, kind: input, shape index: {}]   ;;  %s2245_s2 = inlined_call_operand.hbm [shape: f32[128,128], index: 2, kind: input, shape index: {}]   ;;  %s2246_s3 = inlined_call_operand.vmem [shape: f32[1,128], index: 3, kind: input, shape index: {}]   ;;  %s2247_s4 = inlined_call_operand.hbm [shape: f32[128,128], index: 4, kind: input, shape index: {}]   ;;  %s2248_s5 = inlined_call_operand.vmem [shape: f32[1,128], index: 5, kind: input, shape index: {}]   ;;  %s2249_s6 = inlined_call_operand.hbm [shape: f32[8,128], index: 6, kind: output, shape index: {}]  }
   0x1   :  { %12 = vsyncpa [#allocation6], 0 }
   0x2   :  { %13 = vsyncpa [#allocation4], 0  ;;  %s1888_s21 = smov [#allocation2]   ;;  %s1816_s25 = scalar_lea.hbm %s2245_s2, 2048 }
   0x3   :  { %s23_s22 = sshll.u32 %s1888_s21, 4  ;;  %p1817_p0 = scmp.ne.s32.totalorder %s2245_s2, %s1816_s25  ;;  %s24_s22 = int_to_ptr.vmem [resolvable:$true] %s23_s22 }
   0x4   :  { %p1820_p1 = scmp.lt.u32.totalorder %s1816_s25, %s2245_s2 }
   0x6   :  { %p1822_p2 = pnand %p1820_p1, %p1817_p0 }
   0x8   :  { %1825 = shalt.err (!%p1822_p2)
}
   0x9   :  { %s1826_s30 = scalar_lea.vmem %s24_s22, 2048  ;;  %p1831_p4 = scmp.lt.s32.totalorder %s24_s22, %s24_s22 }
   0xa   :  { %p1827_p3 = scmp.ne.s32.totalorder %s24_s22, %s1826_s30  ;;  %p1832_p5 = scmp.lt.s32.totalorder %s1826_s30, %s1826_s30 }
   0xc   :  { %p1833_p6 = por %p1832_p5, %p1831_p4 }
   0xe   :  { %p1834_p7 = pnand %p1833_p6, %p1827_p3 }
  0x10   :  { %1837 = shalt.err (!%p1834_p7)
}
  0x11   :  { %s1889_s7 = smov 128   ;;  %s1890_s8 = smov 8  }
  0x12   :  { %29 = dma.hbm_to_vmem [thread:$0]  %s2245_s2, 2048, %s24_s22, [#allocation3], %s1889_s7, %s1889_s7, %s1890_s8  }
  0x13   :  { %s1891_s11 = smov [#allocation5]   ;;  %s1838_s15 = scalar_lea.hbm %s2247_s4, 2048 }
  0x14   :  { %s37_s12 = sshll.u32 %s1891_s11, 4  ;;  %p1839_p8 = scmp.ne.s32.totalorder %s2247_s4, %s1838_s15  ;;  %s38_s12 = int_to_ptr.vmem [resolvable:$true] %s37_s12 }
  0x15   :  { %p1842_p9 = scmp.lt.u32.totalorder %s1838_s15, %s2247_s4 }
  0x17   :  { %p1844_p10 = pnand %p1842_p9, %p1839_p8 }
  0x19   :  { %1847 = shalt.err (!%p1844_p10)
}
  0x1a   :  { %s1848_s20 = scalar_lea.vmem %s38_s12, 2048  ;;  %p1853_p12 = scmp.lt.s32.totalorder %s38_s12, %s38_s12 }
  0x1b   :  { %p1849_p11 = scmp.ne.s32.totalorder %s38_s12, %s1848_s20  ;;  %p1854_p13 = scmp.lt.s32.totalorder %s1848_s20, %s1848_s20 }
  0x1d   :  { %p1855_p0 = por %p1854_p13, %p1853_p12 }
  0x1f   :  { %p1856_p1 = pnand %p1855_p0, %p1849_p11 }
  0x21   :  { %1859 = shalt.err (!%p1856_p1)
}
  0x22   :  { %43 = dma.hbm_to_vmem [thread:$0]  %s2247_s4, 2048, %s38_s12, [#allocation6], %s1889_s7, %s1889_s7, %s1890_s8  }
  0x23   :  { %1882 = dma.done.wait [#allocation3], 2048  }
  0x24   :  { %1883 = vsyncadd [#allocation3], 4294965248 }
  0x25   :  { %1884 = dma.done.wait [#allocation6], 2048  }
  0x26   :  { %1885 = vsyncadd [#allocation6], 4294965248  ;;  %v1892_v0 = vmov 0.0|0.0   ;;  %vm1893_vm0 = vmmov 0   ;;  %v1894_v1 = vmov 0.0   ;;  %v201_v2 = vld [vmem:[#allocation2] sm:$0xff] }
  0x27   :  { %1541 = vmatprep.subr.bf16.mxu1 %v1892_v0  ;;  %1250 = vmatprep.mubr.msk.f32.mxu1 %vm1893_vm0, %v1894_v1  ;;  %v202_v3 = vld [vmem:[#allocation2 + $0x8] sm:$0xff]  ;;  %v203_v4 = vld [vmem:[#allocation2 + $0x10] sm:$0xff]  ;;  %v204_v6 = vld [vmem:[#allocation2 + $0x18] sm:$0xff]  ;;  %vm71_vm1 = vcmask 261120   ;;  %s1895_s19 = smov 32   ;;  %s1896_s20 = smov 96  }
  0x28   :  { %v1961_v5 = vpack.c.bf16 %v202_v3, %v201_v2  ;;  %v1964_v7 = vpack.c.bf16 %v204_v6, %v203_v4  ;;  %v60_v8 = vld [vmem:[%s2244_s1] sm:$0xff]  ;;  %v61_v9 = vld [vmem:[%s2244_s1 + $0x8] sm:$0xff]  ;;  %v62_v13 = vld [vmem:[%s2244_s1 + $0x10] sm:$0xff]  ;;  %s1897_s4 = smov 64   ;;  %s1898_s23 = smov [#allocation7]  }
  0x29   :  { %v205_v10 = vld [vmem:[#allocation2 + $0x20] sm:$0xff]  ;;  %v206_v11 = vld [vmem:[#allocation2 + $0x28] sm:$0xff]  ;;  %v1533_v12 = vpack.c.bf16 %v61_v9, %v60_v8  ;;  %v63_v14 = vld [vmem:[%s2244_s1 + $0x18] sm:$0xff]  ;;  %s1013_s24 = sshll.u32 %s1898_s23, 4  ;;  %s1014_s24 = int_to_ptr.vmem [resolvable:$true] %s1013_s24 }
  0x2a   :  { %1543 = vmatpush3.bf16.msra.mxu1 %v1961_v5  ;;  %v1537_v15 = vpack.c.bf16 %v63_v14, %v62_v13  ;;  %v52_v16 = vld [vmem:[%s2243_s0] sm:$0xff]  ;;  %v1983_v17 = vpack.c.bf16 %v206_v11, %v205_v10  ;;  %v207_v18 = vld [vmem:[#allocation2 + $0x30] sm:$0xff]  ;;  %v208_v19 = vld [vmem:[#allocation2 + $0x38] sm:$0xff]  ;;  %s1860_s25 = scalar_lea.vmem %s1014_s24, 128  ;;  %p1865_p3 = scmp.lt.s32.totalorder %s1014_s24, %s1014_s24 }
  0x2b   :  { %1544 = vmatprep.subr.bf16.mxu1 %v1892_v0  ;;  %1534 = vmatprep.subr.bf16.mxu0 %v1533_v12  ;;  %v1988_v20 = vpack.c.bf16 %v208_v19, %v207_v18  ;;  %v53_v21 = vld [vmem:[%s2243_s0 + $0x8] sm:$0xff]  ;;  %v209_v22 = vld [vmem:[#allocation2 + $0x40] sm:$0xff]  ;;  %v211_v25 = vld [vmem:[#allocation2 + $0x50] sm:$0xff]  ;;  %p1861_p2 = scmp.ne.s32.totalorder %s1014_s24, %s1860_s25  ;;  %p1866_p4 = scmp.lt.s32.totalorder %s1860_s25, %s1860_s25 }
  0x2c   :  { %1536 = vmatpush3.bf16.msra.mxu0 %v1533_v12  ;;  %1206 = vmatprep.mubr.msk.f32.mxu0 %vm71_vm1, %v52_v16  ;;  %v210_v23 = vld [vmem:[#allocation2 + $0x48] sm:$0xff]  ;;  %v212_v26 = vld [vmem:[#allocation2 + $0x58] sm:$0xff]  ;;  %v213_v28 = vld [vmem:[#allocation2 + $0x60] sm:$0xff] }
  0x2d   :  { %1538 = vmatprep.subr.bf16.mxu0 %v1537_v15  ;;  %v1997_v24 = vpack.c.bf16 %v210_v23, %v209_v22  ;;  %v2003_v27 = vpack.c.bf16 %v212_v26, %v211_v25  ;;  %v214_v29 = vld [vmem:[#allocation2 + $0x68] sm:$0xff]  ;;  %v215_v31 = vld [vmem:[#allocation2 + $0x70] sm:$0xff]  ;;  %v216_v32 = vld [vmem:[#allocation2 + $0x78] sm:$0xff]  ;;  %p1867_p5 = por %p1866_p4, %p1865_p3 }
  0x2e   :  { %1546 = vmatpush3.bf16.msra.mxu1 %v1964_v7  ;;  %v2009_v30 = vpack.c.bf16 %v214_v29, %v213_v28  ;;  %v2015_v33 = vpack.c.bf16 %v216_v32, %v215_v31  ;;  %v2054_v36 = vld [vmem:[%s2246_s3] ss:$0 sm:$0xff]  ;;  %v54_v42 = vld [vmem:[%s2243_s0 + $0x10] sm:$0xff]  ;;  %v55_v43 = vld [vmem:[%s2243_s0 + $0x18] sm:$0xff] }
  0x2f   :  { %1547 = vmatprep.subr.bf16.mxu1 %v1892_v0  ;;  %v56_v45 = vld [vmem:[%s2243_s0 + $0x20] sm:$0xff]  ;;  %v57_v47 = vld [vmem:[%s2243_s0 + $0x28] sm:$0xff]  ;;  %v58_v49 = vld [vmem:[%s2243_s0 + $0x30] sm:$0xff]  ;;  %p1868_p6 = pnand %p1867_p5, %p1861_p2 }
  0x30   :  { %1540 = vmatpush3.bf16.msra.mxu0 %v1537_v15  ;;  %v59_v50 = vld [vmem:[%s2243_s0 + $0x38] sm:$0xff] }
  0x31   :  { %1565 = vmatprep.subr.bf16.mxu0 %v1892_v0 }
  0x32   :  { %1549 = vmatpush3.bf16.msra.mxu1 %v1983_v17 }
  0x33   :  { %1550 = vmatprep.subr.bf16.mxu1 %v1892_v0  ;;  %1207 = vmatmul.mubr.msk.f32.vlgmr.msra.gmra.mrb[0].mxu0 %vm71_vm1, %v53_v21 }
  0x34   :  { %1567 = vmatpush3.bf16.msra.mxu0 %v1961_v5  ;;  %1209 = vmatprep.mubr.msk.f32.mxu0 %vm71_vm1, %v54_v42 }
  0x35   :  { %1568 = vmatprep.subr.bf16.mxu0 %v1892_v0 }
  0x36   :  { %1552 = vmatpush3.bf16.msra.mxu1 %v1988_v20 }
  0x37   :  { %1553 = vmatprep.subr.bf16.mxu1 %v1892_v0  ;;  %1210 = vmatmul.mubr.msk.f32.gmra.mrb[2].mxu0 %vm71_vm1, %v55_v43 }
  0x38   :  { %1570 = vmatpush3.bf16.msra.mxu0 %v1964_v7  ;;  %1212 = vmatprep.mubr.msk.f32.mxu0 %vm71_vm1, %v56_v45 }
  0x39   :  { %1571 = vmatprep.subr.bf16.mxu0 %v1892_v0 }
  0x3a   :  { %1555 = vmatpush3.bf16.msra.mxu1 %v1997_v24 }
  0x3b   :  { %1556 = vmatprep.subr.bf16.mxu1 %v1892_v0  ;;  %1213 = vmatmul.mubr.msk.f32.gmra.mrb[4].mxu0 %vm71_vm1, %v57_v47 }
  0x3c   :  { %1573 = vmatpush3.bf16.msra.mxu0 %v1983_v17  ;;  %1215 = vmatprep.mubr.msk.f32.mxu0 %vm71_vm1, %v58_v49 }
  0x3d   :  { %1574 = vmatprep.subr.bf16.mxu0 %v1892_v0 }
  0x3e   :  { %1558 = vmatpush3.bf16.msra.mxu1 %v2003_v27 }
  0x3f   :  { %1559 = vmatprep.subr.bf16.mxu1 %v1892_v0  ;;  %1216 = vmatmul.mubr.msk.f32.gmra.mrb[6].mxu0 %vm71_vm1, %v59_v50 }
  0x40   :  { %1576 = vmatpush3.bf16.msra.mxu0 %v1988_v20  ;;  %1285 = vmatprep.mubr.msk.f32.mxu0 %vm1893_vm0, %v1894_v1 }
  0x41   :  { %1577 = vmatprep.subr.bf16.mxu0 %v1892_v0 }
  0x42   :  { %1561 = vmatpush3.bf16.msra.mxu1 %v2009_v30 }
  0x43   :  { %1562 = vmatprep.subr.bf16.mxu1 %v1892_v0 }
  0x44   :  { %1579 = vmatpush3.bf16.msra.mxu0 %v1997_v24 }
  0x45   :  { %1580 = vmatprep.subr.bf16.mxu0 %v1892_v0 }
  0x46   :  { %1564 = vmatpush3.bf16.msra.mxu1 %v2015_v33 }
  0x47   :  { %1589 = vmatprep.subr.bf16.mxu1 %v1892_v0 }
  0x48   :  { %1582 = vmatpush3.bf16.msra.mxu0 %v2003_v27 }
  0x49   :  { %1251 = vmatmul.mubr.f32.vlgmr.msra.gmra.mrb[0].mxu1 %v1894_v1  ;;  %1583 = vmatprep.subr.bf16.mxu0 %v1892_v0 }
  0x4a   :  { %1591 = vmatpush3.bf16.msra.mxu1 %v1961_v5  ;;  %1320 = vmatprep.mubr.msk.f32.mxu1 %vm1893_vm0, %v1894_v1 }
  0x4b   :  { %1592 = vmatprep.subr.bf16.mxu1 %v1892_v0 }
  0x4c   :  { %1585 = vmatpush3.bf16.msra.mxu0 %v2009_v30 }
  0x4d   :  { %1586 = vmatprep.subr.bf16.mxu0 %v1892_v0 }
  0x4e   :  { %1594 = vmatpush3.bf16.msra.mxu1 %v1964_v7 }
  0x4f   :  { %1595 = vmatprep.subr.bf16.mxu1 %v1892_v0 }
  0x50   :  { %1588 = vmatpush3.bf16.msra.mxu0 %v2015_v33 }
  0x51   :  { %1613 = vmatprep.subr.bf16.mxu0 %v1892_v0 }
  0x52   :  { %1597 = vmatpush3.bf16.msra.mxu1 %v1983_v17 }
  0x53   :  { %1598 = vmatprep.subr.bf16.mxu1 %v1892_v0 }
  0x56   :  { %1600 = vmatpush3.bf16.msra.mxu1 %v1988_v20 }
  0x57   :  { %1601 = vmatprep.subr.bf16.mxu1 %v1892_v0 }
  0x5a   :  { %1603 = vmatpush3.bf16.msra.mxu1 %v1997_v24 }
  0x5b   :  { %1604 = vmatprep.subr.bf16.mxu1 %v1892_v0 }
  0x5e   :  { %1606 = vmatpush3.bf16.msra.mxu1 %v2003_v27 }
  0x5f   :  { %1607 = vmatprep.subr.bf16.mxu1 %v1892_v0 }
  0x62   :  { %1609 = vmatpush3.bf16.msra.mxu1 %v2009_v30 }
  0x63   :  { %1610 = vmatprep.subr.bf16.mxu1 %v1892_v0 }
  0x66   :  { %1612 = vmatpush3.bf16.msra.mxu1 %v2015_v33 }
  0x67   :  { %1637 = vmatprep.subr.bf16.mxu1 %v1892_v0 }
 0x106   :  { %v2049_v34 = vpop.f32.mrb[0].mxu0 }
 0x107   :  { %v162_v35 = vpop.f32.mrb[1].mxu0  ;;  %v168_v4 = vadd.f32 %v2049_v34, %v2054_v36 }
 0x108   :  { %v163_v37 = vadd.f32 %v2054_v36, %v162_v35 }
 0x10a   :  { %v2104_v60 = vpop.f32.mrb[2].mxu0 }
 0x10b   :  { %v172_v61 = vpop.f32.mrb[3].mxu0  ;;  %v178_v47 = vadd.f32 %v2104_v60, %v2054_v36 }
 0x10c   :  { %v173_v26 = vadd.f32 %v2054_v36, %v172_v61 }
 0x10e   :  { %v2106_v62 = vpop.f32.mrb[4].mxu0 }
 0x10f   :  { %v2108_v63 = vpop.f32.mrb[5].mxu0 }
 0x112   :  { %v2110_v2 = vpop.f32.mrb[6].mxu0 }
 0x113   :  { %v2112_v3 = vpop.f32.mrb[7].mxu0 }
 0x11c   :  { %v283_v38 = vpop.f32.mrb[0].mxu1 }
 0x11d   :  { %v287_v39 = vadd.f32 %v283_v38, %v163_v37  ;;  %v1252_v40 = vpop.f32.mrb[1].mxu1 }
 0x11f   :  { %v288_v41 = vmul.f32 0.5, %v287_v39 }
 0x121   :  { %1768 = vtanh.f32 %v288_v41 }
 0x122   :  { %1770 = vtanh.f32 %v287_v39 }
 0x12b   :  { %v1769_v44 = vpop.eup %1768 }
 0x12c   :  { %v290_v46 = vmul.f32 0.5, %v1769_v44  ;;  %v1771_v51 = vpop.eup %1770 }
 0x12e   :  { %v291_v48 = vadd.f32 0.5, %v290_v46 }
 0x130   :  { %297 = vrot.lane.b32.xlu1 %v291_v48, %s1895_s19  ;;  %293 = vrot.lane.b32.xlu0 %v291_v48, %s1896_s20 }
 0x134   :  { %295 = vrot.lane.b32.xlu0 %v1771_v51, %s1897_s4 }
 0x1a2   :  { %v294_v52 = vpop.permute.xlu0 %293  ;;  %v298_v58 = vpop.permute.xlu1 %297 }
 0x1a3   :  { %v299_v54 = vmul.f32 0.0, %v294_v52 }
 0x1a6   :  { %v296_v53 = vpop.permute.xlu0 %295 }
 0x1a7   :  { %v300_v55 = vmul.f32 %v296_v53, %v291_v48 }
 0x1a9   :  { %v301_v56 = vadd.f32 %v300_v55, %v299_v54 }
 0x1ab   :  { %1772 = vtanh.f32 %v301_v56 }
 0x1b5   :  { %v1773_v57 = vpop.eup %1772 }
 0x1b6   :  { %v303_v59 = vmul.f32 %v1773_v57, %v298_v58 }
 0x1b8   :  { %1286 = vmatmul.mubr.f32.vlgmr.msra.gmra.mrb[8].mxu0 %v303_v59 }
 0x1b9   :  { %1615 = vmatpush3.bf16.msra.mxu0 %v1961_v5  ;;  %1355 = vmatprep.mubr.msk.f32.mxu0 %vm1893_vm0, %v1894_v1 }
 0x1ba   :  { %1616 = vmatprep.subr.bf16.mxu0 %v1892_v0 }
 0x1bd   :  { %1618 = vmatpush3.bf16.msra.mxu0 %v1964_v7 }
 0x1be   :  { %1619 = vmatprep.subr.bf16.mxu0 %v1892_v0 }
 0x1c1   :  { %1621 = vmatpush3.bf16.msra.mxu0 %v1983_v17 }
 0x1c2   :  { %1622 = vmatprep.subr.bf16.mxu0 %v1892_v0 }
 0x1c5   :  { %1624 = vmatpush3.bf16.msra.mxu0 %v1988_v20 }
 0x1c6   :  { %1625 = vmatprep.subr.bf16.mxu0 %v1892_v0 }
 0x1c9   :  { %1627 = vmatpush3.bf16.msra.mxu0 %v1997_v24 }
 0x1ca   :  { %1628 = vmatprep.subr.bf16.mxu0 %v1892_v0 }
 0x1cd   :  { %1630 = vmatpush3.bf16.msra.mxu0 %v2003_v27 }
 0x1ce   :  { %1631 = vmatprep.subr.bf16.mxu0 %v1892_v0 }
 0x1d1   :  { %1633 = vmatpush3.bf16.msra.mxu0 %v2009_v30 }
 0x1d2   :  { %1634 = vmatprep.subr.bf16.mxu0 %v1892_v0 }
 0x1d5   :  { %1636 = vmatpush3.bf16.msra.mxu0 %v2015_v33 }
 0x1d6   :  { %1661 = vmatprep.subr.bf16.mxu0 %v1892_v0 }
 0x28b   :  { %v370_v6 = vpop.f32.mrb[8].mxu0 }
 0x28c   :  { %v374_v8 = vadd.f32 %v370_v6, %v168_v4  ;;  %v1287_v9 = vpop.f32.mrb[9].mxu0 }
 0x28e   :  { %v375_v10 = vmul.f32 0.5, %v374_v8  ;;  %1774 = vtanh.f32 %v374_v8  ;;  %v183_v8 = vadd.f32 %v2054_v36, %v2108_v63 }
 0x290   :  { %1776 = vtanh.f32 %v375_v10 }
 0x298   :  { %v1775_v11 = vpop.eup %1774 }
 0x299   :  { %382 = vrot.lane.b32.xlu0 %v1775_v11, %s1897_s4 }
 0x29a   :  { %v1777_v12 = vpop.eup %1776 }
 0x29b   :  { %v377_v13 = vmul.f32 0.5, %v1777_v12 }
 0x29d   :  { %v378_v14 = vadd.f32 0.5, %v377_v13 }
 0x29f   :  { %380 = vrot.lane.b32.xlu1 %v378_v14, %s1896_s20 }
 0x2a3   :  { %384 = vrot.lane.b32.xlu1 %v378_v14, %s1895_s19 }
 0x30b   :  { %v383_v15 = vpop.permute.xlu0 %382 }
 0x30c   :  { %v387_v18 = vmul.f32 %v383_v15, %v378_v14 }
 0x311   :  { %v381_v16 = vpop.permute.xlu1 %380 }
 0x312   :  { %v386_v19 = vmul.f32 %v381_v16, %v301_v56 }
 0x314   :  { %v388_v21 = vadd.f32 %v387_v18, %v386_v19 }
 0x315   :  { %v385_v23 = vpop.permute.xlu1 %384 }
 0x316   :  { %1778 = vtanh.f32 %v388_v21 }
 0x320   :  { %v1779_v22 = vpop.eup %1778 }
 0x321   :  { %v390_v25 = vmul.f32 %v1779_v22, %v385_v23 }
 0x323   :  { %1321 = vmatmul.mubr.f32.vlgmr.msra.gmra.mrb[2].mxu1 %v390_v25 }
 0x324   :  { %1639 = vmatpush3.bf16.msra.mxu1 %v1961_v5  ;;  %1390 = vmatprep.mubr.msk.f32.mxu1 %vm1893_vm0, %v1894_v1 }
 0x325   :  { %1640 = vmatprep.subr.bf16.mxu1 %v1892_v0 }
 0x328   :  { %1642 = vmatpush3.bf16.msra.mxu1 %v1964_v7 }
 0x329   :  { %1643 = vmatprep.subr.bf16.mxu1 %v1892_v0 }
 0x32c   :  { %1645 = vmatpush3.bf16.msra.mxu1 %v1983_v17 }
 0x32d   :  { %1646 = vmatprep.subr.bf16.mxu1 %v1892_v0 }
 0x330   :  { %1648 = vmatpush3.bf16.msra.mxu1 %v1988_v20 }
 0x331   :  { %1649 = vmatprep.subr.bf16.mxu1 %v1892_v0 }
 0x334   :  { %1651 = vmatpush3.bf16.msra.mxu1 %v1997_v24 }
 0x335   :  { %1652 = vmatprep.subr.bf16.mxu1 %v1892_v0 }
 0x338   :  { %1654 = vmatpush3.bf16.msra.mxu1 %v2003_v27 }
 0x339   :  { %1655 = vmatprep.subr.bf16.mxu1 %v1892_v0 }
 0x33c   :  { %1657 = vmatpush3.bf16.msra.mxu1 %v2009_v30 }
 0x33d   :  { %1658 = vmatprep.subr.bf16.mxu1 %v1892_v0 }
 0x340   :  { %1660 = vmatpush3.bf16.msra.mxu1 %v2015_v33 }
 0x341   :  { %1685 = vmatprep.subr.bf16.mxu1 %v1892_v0 }
 0x3f6   :  { %v457_v28 = vpop.f32.mrb[2].mxu1 }
 0x3f7   :  { %v461_v29 = vadd.f32 %v457_v28, %v173_v26  ;;  %v1322_v31 = vpop.f32.mrb[3].mxu1 }
 0x3f9   :  { %v462_v32 = vmul.f32 0.5, %v461_v29  ;;  %1780 = vtanh.f32 %v461_v29 }
 0x3fb   :  { %1782 = vtanh.f32 %v462_v32 }
 0x403   :  { %v1781_v34 = vpop.eup %1780 }
 0x404   :  { %469 = vrot.lane.b32.xlu1 %v1781_v34, %s1897_s4 }
 0x405   :  { %v1783_v35 = vpop.eup %1782 }
 0x406   :  { %v464_v37 = vmul.f32 0.5, %v1783_v35 }
 0x408   :  { %v465_v38 = vadd.f32 0.5, %v464_v37 }
 0x40a   :  { %467 = vrot.lane.b32.xlu0 %v465_v38, %s1896_s20 }
 0x40e   :  { %471 = vrot.lane.b32.xlu0 %v465_v38, %s1895_s19 }
 0x476   :  { %v470_v39 = vpop.permute.xlu1 %469 }
 0x477   :  { %v474_v41 = vmul.f32 %v470_v39, %v465_v38  ;;  %v193_v39 = vadd.f32 %v2054_v36, %v2112_v3 }
 0x47c   :  { %v468_v40 = vpop.permute.xlu0 %467 }
 0x47d   :  { %v473_v42 = vmul.f32 %v468_v40, %v388_v21 }
 0x47f   :  { %v475_v43 = vadd.f32 %v474_v41, %v473_v42 }
 0x480   :  { %v472_v45 = vpop.permute.xlu0 %471 }
 0x481   :  { %1784 = vtanh.f32 %v475_v43 }
 0x48b   :  { %v1785_v44 = vpop.eup %1784 }
 0x48c   :  { %v477_v46 = vmul.f32 %v1785_v44, %v472_v45 }
 0x48e   :  { %1356 = vmatmul.mubr.f32.vlgmr.msra.gmra.mrb[10].mxu0 %v477_v46 }
 0x48f   :  { %1663 = vmatpush3.bf16.msra.mxu0 %v1961_v5  ;;  %1425 = vmatprep.mubr.msk.f32.mxu0 %vm1893_vm0, %v1894_v1 }
 0x490   :  { %1664 = vmatprep.subr.bf16.mxu0 %v1892_v0 }
 0x493   :  { %1666 = vmatpush3.bf16.msra.mxu0 %v1964_v7 }
 0x494   :  { %1667 = vmatprep.subr.bf16.mxu0 %v1892_v0 }
 0x497   :  { %1669 = vmatpush3.bf16.msra.mxu0 %v1983_v17 }
 0x498   :  { %1670 = vmatprep.subr.bf16.mxu0 %v1892_v0 }
 0x49b   :  { %1672 = vmatpush3.bf16.msra.mxu0 %v1988_v20 }
 0x49c   :  { %1673 = vmatprep.subr.bf16.mxu0 %v1892_v0 }
 0x49f   :  { %1675 = vmatpush3.bf16.msra.mxu0 %v1997_v24 }
 0x4a0   :  { %1676 = vmatprep.subr.bf16.mxu0 %v1892_v0 }
 0x4a3   :  { %1678 = vmatpush3.bf16.msra.mxu0 %v2003_v27 }
 0x4a4   :  { %1679 = vmatprep.subr.bf16.mxu0 %v1892_v0 }
 0x4a7   :  { %1681 = vmatpush3.bf16.msra.mxu0 %v2009_v30 }
 0x4a8   :  { %1682 = vmatprep.subr.bf16.mxu0 %v1892_v0 }
 0x4ab   :  { %1684 = vmatpush3.bf16.msra.mxu0 %v2015_v33 }
 0x4ac   :  { %1709 = vmatprep.subr.bf16.mxu0 %v1892_v0 }
 0x561   :  { %v544_v48 = vpop.f32.mrb[10].mxu0 }
 0x562   :  { %v548_v49 = vadd.f32 %v544_v48, %v178_v47  ;;  %v1357_v50 = vpop.f32.mrb[11].mxu0 }
 0x564   :  { %v549_v51 = vmul.f32 0.5, %v548_v49  ;;  %1786 = vtanh.f32 %v548_v49 }
 0x566   :  { %1788 = vtanh.f32 %v549_v51 }
 0x56e   :  { %v1787_v52 = vpop.eup %1786 }
 0x56f   :  { %556 = vrot.lane.b32.xlu0 %v1787_v52, %s1897_s4 }
 0x570   :  { %v1789_v53 = vpop.eup %1788 }
 0x571   :  { %v551_v54 = vmul.f32 0.5, %v1789_v53 }
 0x573   :  { %v552_v55 = vadd.f32 0.5, %v551_v54  ;;  %v913_v54 = vld [vmem:[#allocation5] sm:$0xff] }
 0x575   :  { %554 = vrot.lane.b32.xlu1 %v552_v55, %s1896_s20 }
 0x579   :  { %558 = vrot.lane.b32.xlu1 %v552_v55, %s1895_s19 }
 0x5e1   :  { %v557_v56 = vpop.permute.xlu0 %556 }
 0x5e2   :  { %v561_v58 = vmul.f32 %v557_v56, %v552_v55  ;;  %v914_v55 = vld [vmem:[#allocation5 + $0x8] sm:$0xff]  ;;  %v915_v56 = vld [vmem:[#allocation5 + $0x10] sm:$0xff] }
 0x5e7   :  { %v555_v57 = vpop.permute.xlu1 %554 }
 0x5e8   :  { %v560_v59 = vmul.f32 %v555_v57, %v475_v43  ;;  %v1734_v57 = vpack.c.bf16 %v914_v55, %v913_v54 }
 0x5ea   :  { %v562_v60 = vadd.f32 %v561_v58, %v560_v59  ;;  %v916_v58 = vld [vmem:[#allocation5 + $0x18] sm:$0xff] }
 0x5eb   :  { %v559_v4 = vpop.permute.xlu1 %558  ;;  %v1737_v59 = vpack.c.bf16 %v916_v58, %v915_v56 }
 0x5ec   :  { %1790 = vtanh.f32 %v562_v60 }
 0x5f6   :  { %v1791_v61 = vpop.eup %1790 }
 0x5f7   :  { %v564_v6 = vmul.f32 %v1791_v61, %v559_v4  ;;  %v918_v61 = vld [vmem:[#allocation5 + $0x28] sm:$0xff]  ;;  %v198_v4 = vadd.f32 %v2110_v2, %v2054_v36  ;;  %v924_v2 = vld [vmem:[#allocation5 + $0x58] sm:$0xff] }
 0x5f9   :  { %1391 = vmatmul.mubr.f32.vlgmr.msra.gmra.mrb[4].mxu1 %v564_v6 }
 0x5fa   :  { %1687 = vmatpush3.bf16.msra.mxu1 %v1961_v5  ;;  %1460 = vmatprep.mubr.msk.f32.mxu1 %vm1893_vm0, %v1894_v1 }
 0x5fb   :  { %1688 = vmatprep.subr.bf16.mxu1 %v1892_v0 }
 0x5fe   :  { %1690 = vmatpush3.bf16.msra.mxu1 %v1964_v7 }
 0x5ff   :  { %1691 = vmatprep.subr.bf16.mxu1 %v1892_v0 }
 0x602   :  { %1693 = vmatpush3.bf16.msra.mxu1 %v1983_v17 }
 0x603   :  { %1694 = vmatprep.subr.bf16.mxu1 %v1892_v0 }
 0x606   :  { %1696 = vmatpush3.bf16.msra.mxu1 %v1988_v20 }
 0x607   :  { %1697 = vmatprep.subr.bf16.mxu1 %v1892_v0 }
 0x60a   :  { %1699 = vmatpush3.bf16.msra.mxu1 %v1997_v24 }
 0x60b   :  { %1700 = vmatprep.subr.bf16.mxu1 %v1892_v0 }
 0x60e   :  { %1702 = vmatpush3.bf16.msra.mxu1 %v2003_v27 }
 0x60f   :  { %1703 = vmatprep.subr.bf16.mxu1 %v1892_v0 }
 0x612   :  { %1705 = vmatpush3.bf16.msra.mxu1 %v2009_v30 }
 0x613   :  { %1706 = vmatprep.subr.bf16.mxu1 %v1892_v0 }
 0x616   :  { %1708 = vmatpush3.bf16.msra.mxu1 %v2015_v33 }
 0x617   :  { %1733 = vmatprep.subr.bf16.mxu1 %v1892_v0 }
 0x6cc   :  { %v631_v9 = vpop.f32.mrb[4].mxu1 }
 0x6cd   :  { %v635_v10 = vadd.f32 %v631_v9, %v183_v8  ;;  %v1392_v11 = vpop.f32.mrb[5].mxu1 }
 0x6ce   :  { %v919_v11 = vld [vmem:[#allocation5 + $0x30] sm:$0xff] }
 0x6cf   :  { %v636_v12 = vmul.f32 0.5, %v635_v10  ;;  %1792 = vtanh.f32 %v635_v10 }
 0x6d1   :  { %1794 = vtanh.f32 %v636_v12  ;;  %v920_v12 = vld [vmem:[#allocation5 + $0x38] sm:$0xff] }
 0x6d9   :  { %v1793_v13 = vpop.eup %1792 }
 0x6da   :  { %643 = vrot.lane.b32.xlu1 %v1793_v13, %s1897_s4  ;;  %v1743_v13 = vpack.c.bf16 %v920_v12, %v919_v11 }
 0x6db   :  { %v1795_v14 = vpop.eup %1794 }
 0x6dc   :  { %v638_v15 = vmul.f32 0.5, %v1795_v14 }
 0x6de   :  { %v639_v16 = vadd.f32 0.5, %v638_v15  ;;  %v921_v15 = vld [vmem:[#allocation5 + $0x40] sm:$0xff] }
 0x6e0   :  { %641 = vrot.lane.b32.xlu0 %v639_v16, %s1896_s20 }
 0x6e4   :  { %645 = vrot.lane.b32.xlu0 %v639_v16, %s1895_s19 }
 0x74c   :  { %v644_v18 = vpop.permute.xlu1 %643 }
 0x74d   :  { %v648_v21 = vmul.f32 %v644_v18, %v639_v16  ;;  %v922_v16 = vld [vmem:[#allocation5 + $0x48] sm:$0xff] }
 0x74e   :  { %v1746_v18 = vpack.c.bf16 %v922_v16, %v921_v15 }
 0x752   :  { %v642_v19 = vpop.permute.xlu0 %641 }
 0x753   :  { %v647_v63 = vmul.f32 %v642_v19, %v562_v60  ;;  %v917_v60 = vld [vmem:[#allocation5 + $0x20] sm:$0xff] }
 0x754   :  { %v1740_v6 = vpack.c.bf16 %v918_v61, %v917_v60 }
 0x755   :  { %v649_v22 = vadd.f32 %v648_v21, %v647_v63  ;;  %v925_v63 = vld [vmem:[#allocation5 + $0x60] sm:$0xff] }
 0x756   :  { %v646_v25 = vpop.permute.xlu0 %645 }
 0x757   :  { %1796 = vtanh.f32 %v649_v22 }
 0x761   :  { %v1797_v23 = vpop.eup %1796 }
 0x762   :  { %v651_v26 = vmul.f32 %v1797_v23, %v646_v25 }
 0x764   :  { %1426 = vmatmul.mubr.f32.vlgmr.msra.gmra.mrb[12].mxu0 %v651_v26 }
 0x765   :  { %1711 = vmatpush3.bf16.msra.mxu0 %v1961_v5  ;;  %1495 = vmatprep.mubr.msk.f32.mxu0 %vm1893_vm0, %v1894_v1  ;;  %v188_v5 = vadd.f32 %v2106_v62, %v2054_v36  ;;  %v923_v36 = vld [vmem:[#allocation5 + $0x50] sm:$0xff] }
 0x766   :  { %1712 = vmatprep.subr.bf16.mxu0 %v1892_v0  ;;  %v1749_v19 = vpack.c.bf16 %v924_v2, %v923_v36 }
 0x769   :  { %1714 = vmatpush3.bf16.msra.mxu0 %v1964_v7 }
 0x76a   :  { %1715 = vmatprep.subr.bf16.mxu0 %v1892_v0 }
 0x76d   :  { %1717 = vmatpush3.bf16.msra.mxu0 %v1983_v17 }
 0x76e   :  { %1718 = vmatprep.subr.bf16.mxu0 %v1892_v0 }
 0x771   :  { %1720 = vmatpush3.bf16.msra.mxu0 %v1988_v20 }
 0x772   :  { %1721 = vmatprep.subr.bf16.mxu0 %v1892_v0 }
 0x775   :  { %1723 = vmatpush3.bf16.msra.mxu0 %v1997_v24 }
 0x776   :  { %1724 = vmatprep.subr.bf16.mxu0 %v1892_v0 }
 0x779   :  { %1726 = vmatpush3.bf16.msra.mxu0 %v2003_v27 }
 0x77a   :  { %1727 = vmatprep.subr.bf16.mxu0 %v1892_v0 }
 0x77d   :  { %1729 = vmatpush3.bf16.msra.mxu0 %v2009_v30 }
 0x77e   :  { %1730 = vmatprep.subr.bf16.mxu0 %v1892_v0 }
 0x781   :  { %1732 = vmatpush3.bf16.msra.mxu0 %v2015_v33 }
 0x837   :  { %v718_v7 = vpop.f32.mrb[12].mxu0 }
 0x838   :  { %v722_v17 = vadd.f32 %v718_v7, %v188_v5  ;;  %v1427_v20 = vpop.f32.mrb[13].mxu0  ;;  %v927_v7 = vld [vmem:[#allocation5 + $0x70] sm:$0xff] }
 0x83a   :  { %v723_v28 = vmul.f32 0.5, %v722_v17  ;;  %1798 = vtanh.f32 %v722_v17  ;;  %v928_v17 = vld [vmem:[#allocation5 + $0x78] sm:$0xff] }
 0x83b   :  { %v1755_v20 = vpack.c.bf16 %v928_v17, %v927_v7 }
 0x83c   :  { %1800 = vtanh.f32 %v723_v28 }
 0x844   :  { %v1799_v24 = vpop.eup %1798 }
 0x845   :  { %730 = vrot.lane.b32.xlu0 %v1799_v24, %s1897_s4 }
 0x846   :  { %v1801_v27 = vpop.eup %1800 }
 0x847   :  { %v725_v29 = vmul.f32 0.5, %v1801_v27 }
 0x849   :  { %v726_v31 = vadd.f32 0.5, %v725_v29 }
 0x84b   :  { %728 = vrot.lane.b32.xlu1 %v726_v31, %s1896_s20 }
 0x84f   :  { %732 = vrot.lane.b32.xlu1 %v726_v31, %s1895_s19 }
 0x8b7   :  { %v731_v30 = vpop.permute.xlu0 %730 }
 0x8b8   :  { %v735_v32 = vmul.f32 %v731_v30, %v726_v31 }
 0x8bd   :  { %v729_v33 = vpop.permute.xlu1 %728 }
 0x8be   :  { %v734_v62 = vmul.f32 %v729_v33, %v649_v22  ;;  %v926_v22 = vld [vmem:[#allocation5 + $0x68] sm:$0xff] }
 0x8bf   :  { %v1752_v25 = vpack.c.bf16 %v926_v22, %v925_v63 }
 0x8c0   :  { %v736_v34 = vadd.f32 %v735_v32, %v734_v62 }
 0x8c1   :  { %v733_v37 = vpop.permute.xlu1 %732 }
 0x8c2   :  { %1802 = vtanh.f32 %v736_v34 }
 0x8cc   :  { %v1803_v35 = vpop.eup %1802 }
 0x8cd   :  { %v738_v38 = vmul.f32 %v1803_v35, %v733_v37 }
 0x8cf   :  { %1461 = vmatmul.mubr.f32.vlgmr.msra.gmra.mrb[6].mxu1 %v738_v38 }
 0x8d0   :  { %1530 = vmatprep.mubr.msk.f32.mxu1 %vm1893_vm0, %v1894_v1  ;;  %1735 = vmatpush3.bf16.msra.mxu1 %v1734_v57 }
 0x8d1   :  { %1736 = vmatprep.subr.bf16.mxu1 %v1892_v0 }
 0x8d4   :  { %1738 = vmatpush3.bf16.msra.mxu1 %v1737_v59 }
 0x8d5   :  { %1739 = vmatprep.subr.bf16.mxu1 %v1892_v0 }
 0x8d8   :  { %1741 = vmatpush3.bf16.msra.mxu1 %v1740_v6 }
 0x8d9   :  { %1742 = vmatprep.subr.bf16.mxu1 %v1892_v0 }
 0x8dc   :  { %1744 = vmatpush3.bf16.msra.mxu1 %v1743_v13 }
 0x8dd   :  { %1745 = vmatprep.subr.bf16.mxu1 %v1892_v0 }
 0x8e0   :  { %1747 = vmatpush3.bf16.msra.mxu1 %v1746_v18 }
 0x8e1   :  { %1748 = vmatprep.subr.bf16.mxu1 %v1892_v0 }
 0x8e4   :  { %1750 = vmatpush3.bf16.msra.mxu1 %v1749_v19 }
 0x8e5   :  { %1751 = vmatprep.subr.bf16.mxu1 %v1892_v0 }
 0x8e8   :  { %1753 = vmatpush3.bf16.msra.mxu1 %v1752_v25 }
 0x8e9   :  { %1754 = vmatprep.subr.bf16.mxu1 %v1892_v0  ;;  %v1032_v0 = vld [vmem:[%s2248_s5] ss:$0 sm:$0xff] }
 0x8ec   :  { %1756 = vmatpush3.bf16.msra.mxu1 %v1755_v20 }
 0x9a2   :  { %v805_v40 = vpop.f32.mrb[6].mxu1 }
 0x9a3   :  { %v809_v41 = vadd.f32 %v805_v40, %v193_v39  ;;  %v1462_v42 = vpop.f32.mrb[7].mxu1 }
 0x9a5   :  { %v810_v43 = vmul.f32 0.5, %v809_v41  ;;  %1804 = vtanh.f32 %v809_v41 }
 0x9a7   :  { %1806 = vtanh.f32 %v810_v43 }
 0x9af   :  { %v1805_v44 = vpop.eup %1804 }
 0x9b0   :  { %817 = vrot.lane.b32.xlu1 %v1805_v44, %s1897_s4 }
 0x9b1   :  { %v1807_v45 = vpop.eup %1806 }
 0x9b2   :  { %v812_v46 = vmul.f32 0.5, %v1807_v45 }
 0x9b4   :  { %v813_v47 = vadd.f32 0.5, %v812_v46 }
 0x9b6   :  { %815 = vrot.lane.b32.xlu0 %v813_v47, %s1896_s20 }
 0x9ba   :  { %819 = vrot.lane.b32.xlu0 %v813_v47, %s1895_s19 }
 0xa22   :  { %v818_v1 = vpop.permute.xlu1 %817 }
 0xa23   :  { %v822_v49 = vmul.f32 %v818_v1, %v813_v47 }
 0xa28   :  { %v816_v48 = vpop.permute.xlu0 %815 }
 0xa29   :  { %v821_v3 = vmul.f32 %v816_v48, %v736_v34 }
 0xa2b   :  { %v823_v50 = vadd.f32 %v822_v49, %v821_v3 }
 0xa2c   :  { %v820_v52 = vpop.permute.xlu0 %819 }
 0xa2d   :  { %1808 = vtanh.f32 %v823_v50 }
 0xa37   :  { %v1809_v51 = vpop.eup %1808 }
 0xa38   :  { %v825_v53 = vmul.f32 %v1809_v51, %v820_v52 }
 0xa3a   :  { %1496 = vmatmul.mubr.f32.vlgmr.msra.gmra.mrb[14].mxu0 %v825_v53 }
 0xb0d   :  { %v892_v8 = vpop.f32.mrb[14].mxu0 }
 0xb0e   :  { %v896_v9 = vadd.f32 %v892_v8, %v198_v4  ;;  %v1497_v10 = vpop.f32.mrb[15].mxu0 }
 0xb10   :  { %v897_v14 = vmul.f32 0.5, %v896_v9  ;;  %1810 = vtanh.f32 %v896_v9 }
 0xb12   :  { %1812 = vtanh.f32 %v897_v14 }
 0xb1a   :  { %v1811_v21 = vpop.eup %1810 }
 0xb1b   :  { %904 = vrot.lane.b32.xlu0 %v1811_v21, %s1897_s4 }
 0xb1c   :  { %v1813_v23 = vpop.eup %1812 }
 0xb1d   :  { %v899_v26 = vmul.f32 0.5, %v1813_v23 }
 0xb1f   :  { %v900_v5 = vadd.f32 0.5, %v899_v26 }
 0xb21   :  { %902 = vrot.lane.b32.xlu1 %v900_v5, %s1896_s20 }
 0xb25   :  { %906 = vrot.lane.b32.xlu1 %v900_v5, %s1895_s19 }
 0xb8d   :  { %v905_v28 = vpop.permute.xlu0 %904 }
 0xb8e   :  { %v909_v27 = vmul.f32 %v905_v28, %v900_v5 }
 0xb93   :  { %v903_v24 = vpop.permute.xlu1 %902 }
 0xb94   :  { %v908_v29 = vmul.f32 %v903_v24, %v823_v50 }
 0xb96   :  { %v910_v31 = vadd.f32 %v909_v27, %v908_v29 }
 0xb97   :  { %v907_v33 = vpop.permute.xlu1 %906 }
 0xb98   :  { %1814 = vtanh.f32 %v910_v31 }
 0xba2   :  { %v1815_v30 = vpop.eup %1814 }
 0xba3   :  { %v912_v32 = vmul.f32 %v1815_v30, %v907_v33 }
 0xba5   :  { %1531 = vmatmul.mubr.f32.vlgmr.msra.gmra.mrb[8].mxu1 %v912_v32 }
 0xc78   :  { %v1002_v62 = vpop.f32.mrb[8].mxu1 }
 0xc79   :  { %v1003_v34 = vadd.f32 %v1032_v0, %v1002_v62  ;;  %v1532_v35 = vpop.f32.mrb[9].mxu1 }
 0xc7b   :  { %1006 = vst [vmem:[#allocation7] sm:$0xff] %v1003_v34 }
 0xc7c   :  { %1871 = shalt.err (!%p1868_p6)
}
 0xc7d   :  { %s1872_s28 = scalar_lea.hbm %s2249_s6, 128 }
 0xc7e   :  { %p1873_p7 = scmp.ne.s32.totalorder %s2249_s6, %s1872_s28  ;;  %p1876_p8 = scmp.lt.u32.totalorder %s1872_s28, %s2249_s6 }
 0xc80   :  { %p1878_p9 = pnand %p1876_p8, %p1873_p7 }
 0xc82   :  { %1881 = shalt.err (!%p1878_p9)
}
 0xc83   :  { %1016 = dma.vmem_to_hbm [thread:$0]  %s1014_s24, 128, %s2249_s6, [#allocation4]  }
 0xc84   :  { %1886 = dma.done.wait [#allocation4], 128  }
 0xc85   :  { %1887 = vsyncadd [#allocation4], 4294967168 }
 0xc86   :  { %1020 = vsyncpa [#allocation3], 1 }
 0xc87   :  { %1021 = vsyncpa [#allocation6], 1 }
 0xc88   :  { %1022 = vsyncpa [#allocation4], 1 }

</bundles_post_ra>
